<compile_context>
chip_gen: v5e
topology: v5e:2x2
jax: 0.10.0
libtpu: 0.0.40
codegen_flags: <defaults>
</compile_context>

<pallas_src>
import functools

import jax
import jax.numpy as jnp
from jax.experimental import pallas as pl
from jax.experimental.pallas import tpu as pltpu

_LANE = 512            # lane width of the dense layout (multiple of 128)
_GRAN = _LANE * 8      # tile granularity: keeps tile//_LANE a multiple of 8 sublanes


def _round_up(a: int, b: int) -> int:
    return ((a + b - 1) // b) * b


def _sh_jax(inputs: jax.Array, degree: int = 4) -> jax.Array:
    """Pure-JAX reference (and small-N fast path) mirroring the PyTorch module."""
    x = inputs[..., 0] * 2 - 1
    y = inputs[..., 1] * 2 - 1
    z = inputs[..., 2] * 2 - 1
    xy, xz, yz = x * y, x * z, y * z
    x2, y2, z2 = x * x, y * y, z * z
    out = jnp.zeros((inputs.shape[0], 16), jnp.float32)
    if degree >= 1:
        out = out.at[..., 0].set(0.28209479177387814)
    if degree >= 2:
        out = out.at[..., 1].set(-0.48860251190291987 * y)
        out = out.at[..., 2].set(0.48860251190291987 * z)
        out = out.at[..., 3].set(-0.48860251190291987 * x)
    if degree >= 3:
        out = out.at[..., 4].set(1.0925484305920792 * xy)
        out = out.at[..., 5].set(-1.0925484305920792 * yz)
        out = out.at[..., 6].set(0.94617469575756 * z2 - 0.31539156525252)
        out = out.at[..., 7].set(-1.0925484305920792 * xz)
        out = out.at[..., 8].set(0.5462742152960396 * x2 - 0.5462742152960396 * y2)
    if degree >= 4:
        out = out.at[..., 9].set(0.5900435899266435 * y * (-3.0 * x2 + y2))
        out = out.at[..., 10].set(2.890611442640554 * xy * z)
        out = out.at[..., 11].set(0.4570457994644657 * y * (1.0 - 5.0 * z2))
        out = out.at[..., 12].set(0.3731763325901154 * z * (5.0 * z2 - 3.0))
        out = out.at[..., 13].set(0.4570457994644657 * x * (1.0 - 5.0 * z2))
        out = out.at[..., 14].set(1.445305721320277 * z * (x2 - y2))
        out = out.at[..., 15].set(0.5900435899266435 * x * (-x2 + 3.0 * y2))
    return out


def _sh_kernel(inp_ref, out_ref, *, degree: int):
    """SH basis for one (3, S, L) tile; writes a (16, S, L) tile (S*L points)."""
    # Full-vreg 2-D slabs (shape (tile//_LANE, _LANE)); map [0,1] -> [-1,1].
    x = inp_ref[0] * 2.0 - 1.0
    y = inp_ref[1] * 2.0 - 1.0
    z = inp_ref[2] * 2.0 - 1.0

    xy = x * y
    xz = x * z
    yz = y * z
    x2 = x * x
    y2 = y * y
    z2 = z * z

    zero = jnp.zeros_like(x)
    rows = [zero] * 16

    if degree >= 1:
        rows[0] = jnp.full_like(x, 0.28209479177387814)
    if degree >= 2:
        rows[1] = -0.48860251190291987 * y
        rows[2] = 0.48860251190291987 * z
        rows[3] = -0.48860251190291987 * x
    if degree >= 3:
        x2my2 = x2 - y2                              # shared by rows 8 and 14
        rows[4] = 1.0925484305920792 * xy
        rows[5] = -1.0925484305920792 * yz
        rows[6] = 0.94617469575756 * z2 - 0.31539156525252
        rows[7] = -1.0925484305920792 * xz
        rows[8] = 0.5462742152960396 * x2my2
    if degree >= 4:
        one_m5z2 = 1.0 - 5.0 * z2                    # shared by rows 11 and 13
        rows[9] = 0.5900435899266435 * y * (y2 - 3.0 * x2)
        rows[10] = 2.890611442640554 * xy * z
        rows[11] = 0.4570457994644657 * y * one_m5z2
        rows[12] = 0.3731763325901154 * z * (5.0 * z2 - 3.0)
        rows[13] = 0.4570457994644657 * x * one_m5z2
        rows[14] = 1.445305721320277 * z * x2my2
        rows[15] = 0.5900435899266435 * x * (3.0 * y2 - x2)

    # Dense, unmasked (S, L) stores — one full-vreg row slab per coefficient.
    for k in range(16):
        out_ref[k] = rows[k].astype(out_ref.dtype)


def sh_encoding(inputs: jax.Array,
                degree: int = 4,
                *,
                tile_n: int = 65536,
                out_dtype=jnp.float32,
                small_n_threshold: int = 16384) -> jax.Array:
    """Pallas SHEncoding forward. inputs: (N, 3) float32 in [0, 1]. Returns (N, 16)."""
    assert inputs.ndim == 2 and inputs.shape[-1] == 3
    n = inputs.shape[0]

    # Small batches: the fused XLA elementwise graph beats kernel launch + layout plumbing.
    if n <= small_n_threshold:
        return _sh_jax(inputs.astype(jnp.float32), degree).astype(out_dtype)

    # Tile: multiple of _GRAN (= 4096 pts) so the block is (.., mult-of-8, 512).
    tile = min(_round_up(tile_n, _GRAN), _round_up(n, _GRAN))
    n_pad = _round_up(n, tile)
    s_total = n_pad // _LANE          # sublane-axis extent of the dense layout
    s_tile = tile // _LANE            # sublane-axis extent per block (multiple of 8)

    # Lane-major dense layout: (3, n_pad) -> (3, n_pad//L, L). Tail padded with zeros
    # (their SH values are garbage but are sliced off below).
    x_t = jnp.transpose(inputs.astype(jnp.float32), (1, 0))
    if n_pad != n:
        x_t = jnp.pad(x_t, ((0, 0), (0, n_pad - n)))
    x_3d = x_t.reshape(3, s_total, _LANE)

    grid = (n_pad // tile,)
    kernel = functools.partial(_sh_kernel, degree=degree)

    out_bytes = jnp.dtype(out_dtype).itemsize
    bytes_per_pt = 3 * 4 + 16 * out_bytes
    cp_kwargs = dict(dimension_semantics=("parallel",))
    footprint = 2 * bytes_per_pt * tile               # double-buffered in/out blocks
    if footprint > (14 << 20):                        # only override v5e's 16 MiB default if needed
        cp_kwargs["vmem_limit_bytes"] = min(int(footprint) + (4 << 20), 48 << 20)

    out_3d = pl.pallas_call(
        kernel,
        out_shape=jax.ShapeDtypeStruct((16, s_total, _LANE), out_dtype),
        grid_spec=pltpu.PrefetchScalarGridSpec(
            num_scalar_prefetch=0,
            grid=grid,
            in_specs=[pl.BlockSpec((3, s_tile, _LANE), lambda i: (0, i, 0))],
            out_specs=pl.BlockSpec((16, s_tile, _LANE), lambda i: (0, i, 0)),
        ),
        compiler_params=pltpu.CompilerParams(**cp_kwargs),
        cost_estimate=pl.CostEstimate(
            flops=40 * n_pad, transcendentals=0,
            bytes_accessed=bytes_per_pt * n_pad),
    )(x_3d)

    out = jnp.transpose(out_3d.reshape(16, n_pad), (1, 0))   # (n_pad, 16)
    if n_pad != n:
        out = out[:n]
    return out


if __name__ == "__main__":
    # SHEncoding has no learnable parameters; degree from encoding_config['nested'][0]['degree'].
    degree = 4
    n_input_dims = 3

    key = jax.random.PRNGKey(0)

    # Small batch of direction vectors encoded in [0, 1]; force the Pallas kernel path.
    N = 128
    inputs = jax.random.uniform(key, (N, n_input_dims), dtype=jnp.float32)
    out = jax.block_until_ready(sh_encoding(inputs, degree=degree, small_n_threshold=0))
    ref = _sh_jax(inputs, degree=degree)
    assert out.shape == (N, 16) and out.dtype == jnp.float32
    assert jnp.allclose(out, ref, atol=1e-5, rtol=1e-5)

    # Ragged, multi-tile size (3 grid steps at tile_n=4096) to check padding + pipelining.
    N2 = 9000
    inputs2 = jax.random.uniform(jax.random.PRNGKey(1), (N2, 3), dtype=jnp.float32)
    out2 = jax.block_until_ready(
        sh_encoding(inputs2, degree=degree, tile_n=4096, small_n_threshold=0))
    assert out2.shape == (N2, 16)
    assert jnp.allclose(out2, _sh_jax(inputs2, degree=degree), atol=1e-5, rtol=1e-5)

    # Default small-N fast path (pure JAX) matches too.
    out3 = jax.block_until_ready(sh_encoding(inputs, degree=degree))
    assert jnp.allclose(out3, ref, atol=1e-5, rtol=1e-5)

    print("KERNEL_OK")
</pallas_src>

<mosaic_0001>
module attributes {stable_mosaic.version = 11 : i64} {
  func.func @_sh_kernel(%arg0: i32, %arg1: memref<3x8x512xf32, #tpu.memory_space<vmem>>, %arg2: memref<16x8x512xf32, #tpu.memory_space<vmem>>) attributes {dimension_semantics = [#tpu.dimension_semantics<parallel>], iteration_bounds = array<i64: 1>, scalar_prefetch = 0 : i64, scratch_operands = 0 : i64, tpu.core_type = #tpu.core_type<tc>, window_params = [{transform_indices = @transform_0, window_bounds = array<i64: 3, 8, 512>}, {transform_indices = @transform_1, window_bounds = array<i64: 16, 8, 512>}]} {
    %c0 = arith.constant 0 : index
    %c0_0 = arith.constant 0 : index
    %c0_1 = arith.constant 0 : index
    %0 = vector.load %arg1[%c0, %c0_0, %c0_1] : memref<3x8x512xf32, #tpu.memory_space<vmem>>, vector<1x8x512xf32>
    %1 = vector.shape_cast %0 : vector<1x8x512xf32> to vector<8x512xf32>
    %cst = arith.constant 2.000000e+00 : f32
    %2 = vector.broadcast %cst : f32 to vector<8x512xf32>
    %3 = arith.mulf %1, %2 : vector<8x512xf32>
    %cst_2 = arith.constant 1.000000e+00 : f32
    %4 = vector.broadcast %cst_2 : f32 to vector<8x512xf32>
    %5 = arith.subf %3, %4 : vector<8x512xf32>
    %c1 = arith.constant 1 : index
    %c0_3 = arith.constant 0 : index
    %c0_4 = arith.constant 0 : index
    %6 = vector.load %arg1[%c1, %c0_3, %c0_4] : memref<3x8x512xf32, #tpu.memory_space<vmem>>, vector<1x8x512xf32>
    %7 = vector.shape_cast %6 : vector<1x8x512xf32> to vector<8x512xf32>
    %cst_5 = arith.constant 2.000000e+00 : f32
    %8 = vector.broadcast %cst_5 : f32 to vector<8x512xf32>
    %9 = arith.mulf %7, %8 : vector<8x512xf32>
    %cst_6 = arith.constant 1.000000e+00 : f32
    %10 = vector.broadcast %cst_6 : f32 to vector<8x512xf32>
    %11 = arith.subf %9, %10 : vector<8x512xf32>
    %c2 = arith.constant 2 : index
    %c0_7 = arith.constant 0 : index
    %c0_8 = arith.constant 0 : index
    %12 = vector.load %arg1[%c2, %c0_7, %c0_8] : memref<3x8x512xf32, #tpu.memory_space<vmem>>, vector<1x8x512xf32>
    %13 = vector.shape_cast %12 : vector<1x8x512xf32> to vector<8x512xf32>
    %cst_9 = arith.constant 2.000000e+00 : f32
    %14 = vector.broadcast %cst_9 : f32 to vector<8x512xf32>
    %15 = arith.mulf %13, %14 : vector<8x512xf32>
    %cst_10 = arith.constant 1.000000e+00 : f32
    %16 = vector.broadcast %cst_10 : f32 to vector<8x512xf32>
    %17 = arith.subf %15, %16 : vector<8x512xf32>
    %18 = arith.mulf %5, %11 : vector<8x512xf32>
    %19 = arith.mulf %5, %17 : vector<8x512xf32>
    %20 = arith.mulf %11, %17 : vector<8x512xf32>
    %21 = arith.mulf %5, %5 : vector<8x512xf32>
    %22 = arith.mulf %11, %11 : vector<8x512xf32>
    %23 = arith.mulf %17, %17 : vector<8x512xf32>
    %cst_11 = arith.constant 0.282094806 : f32
    %24 = vector.broadcast %cst_11 : f32 to vector<8x512xf32>
    %cst_12 = arith.constant -0.488602519 : f32
    %25 = vector.broadcast %cst_12 : f32 to vector<8x512xf32>
    %26 = arith.mulf %25, %11 : vector<8x512xf32>
    %cst_13 = arith.constant 0.488602519 : f32
    %27 = vector.broadcast %cst_13 : f32 to vector<8x512xf32>
    %28 = arith.mulf %27, %17 : vector<8x512xf32>
    %cst_14 = arith.constant -0.488602519 : f32
    %29 = vector.broadcast %cst_14 : f32 to vector<8x512xf32>
    %30 = arith.mulf %29, %5 : vector<8x512xf32>
    %31 = arith.subf %21, %22 : vector<8x512xf32>
    %cst_15 = arith.constant 1.09254849 : f32
    %32 = vector.broadcast %cst_15 : f32 to vector<8x512xf32>
    %33 = arith.mulf %32, %18 : vector<8x512xf32>
    %cst_16 = arith.constant -1.09254849 : f32
    %34 = vector.broadcast %cst_16 : f32 to vector<8x512xf32>
    %35 = arith.mulf %34, %20 : vector<8x512xf32>
    %cst_17 = arith.constant 0.946174681 : f32
    %36 = vector.broadcast %cst_17 : f32 to vector<8x512xf32>
    %37 = arith.mulf %36, %23 : vector<8x512xf32>
    %cst_18 = arith.constant 0.31539157 : f32
    %38 = vector.broadcast %cst_18 : f32 to vector<8x512xf32>
    %39 = arith.subf %37, %38 : vector<8x512xf32>
    %cst_19 = arith.constant -1.09254849 : f32
    %40 = vector.broadcast %cst_19 : f32 to vector<8x512xf32>
    %41 = arith.mulf %40, %19 : vector<8x512xf32>
    %cst_20 = arith.constant 0.546274245 : f32
    %42 = vector.broadcast %cst_20 : f32 to vector<8x512xf32>
    %43 = arith.mulf %42, %31 : vector<8x512xf32>
    %cst_21 = arith.constant 5.000000e+00 : f32
    %44 = vector.broadcast %cst_21 : f32 to vector<8x512xf32>
    %45 = arith.mulf %44, %23 : vector<8x512xf32>
    %cst_22 = arith.constant 1.000000e+00 : f32
    %46 = vector.broadcast %cst_22 : f32 to vector<8x512xf32>
    %47 = arith.subf %46, %45 : vector<8x512xf32>
    %cst_23 = arith.constant 0.590043604 : f32
    %48 = vector.broadcast %cst_23 : f32 to vector<8x512xf32>
    %49 = arith.mulf %48, %11 : vector<8x512xf32>
    %cst_24 = arith.constant 3.000000e+00 : f32
    %50 = vector.broadcast %cst_24 : f32 to vector<8x512xf32>
    %51 = arith.mulf %50, %21 : vector<8x512xf32>
    %52 = arith.subf %22, %51 : vector<8x512xf32>
    %53 = arith.mulf %49, %52 : vector<8x512xf32>
    %cst_25 = arith.constant 2.89061141 : f32
    %54 = vector.broadcast %cst_25 : f32 to vector<8x512xf32>
    %55 = arith.mulf %54, %18 : vector<8x512xf32>
    %56 = arith.mulf %55, %17 : vector<8x512xf32>
    %cst_26 = arith.constant 0.457045794 : f32
    %57 = vector.broadcast %cst_26 : f32 to vector<8x512xf32>
    %58 = arith.mulf %57, %11 : vector<8x512xf32>
    %59 = arith.mulf %58, %47 : vector<8x512xf32>
    %cst_27 = arith.constant 0.373176336 : f32
    %60 = vector.broadcast %cst_27 : f32 to vector<8x512xf32>
    %61 = arith.mulf %60, %17 : vector<8x512xf32>
    %cst_28 = arith.constant 5.000000e+00 : f32
    %62 = vector.broadcast %cst_28 : f32 to vector<8x512xf32>
    %63 = arith.mulf %62, %23 : vector<8x512xf32>
    %cst_29 = arith.constant 3.000000e+00 : f32
    %64 = vector.broadcast %cst_29 : f32 to vector<8x512xf32>
    %65 = arith.subf %63, %64 : vector<8x512xf32>
    %66 = arith.mulf %61, %65 : vector<8x512xf32>
    %cst_30 = arith.constant 0.457045794 : f32
    %67 = vector.broadcast %cst_30 : f32 to vector<8x512xf32>
    %68 = arith.mulf %67, %5 : vector<8x512xf32>
    %69 = arith.mulf %68, %47 : vector<8x512xf32>
    %cst_31 = arith.constant 1.44530571 : f32
    %70 = vector.broadcast %cst_31 : f32 to vector<8x512xf32>
    %71 = arith.mulf %70, %17 : vector<8x512xf32>
    %72 = arith.mulf %71, %31 : vector<8x512xf32>
    %cst_32 = arith.constant 0.590043604 : f32
    %73 = vector.broadcast %cst_32 : f32 to vector<8x512xf32>
    %74 = arith.mulf %73, %5 : vector<8x512xf32>
    %cst_33 = arith.constant 3.000000e+00 : f32
    %75 = vector.broadcast %cst_33 : f32 to vector<8x512xf32>
    %76 = arith.mulf %75, %22 : vector<8x512xf32>
    %77 = arith.subf %76, %21 : vector<8x512xf32>
    %78 = arith.mulf %74, %77 : vector<8x512xf32>
    %c0_34 = arith.constant 0 : index
    %c0_35 = arith.constant 0 : index
    %c0_36 = arith.constant 0 : index
    %79 = vector.load %arg2[%c0_34, %c0_35, %c0_36] : memref<16x8x512xf32, #tpu.memory_space<vmem>>, vector<1x8x512xf32>
    %80 = vector.shape_cast %79 : vector<1x8x512xf32> to vector<8x512xf32>
    %81 = vector.shape_cast %24 : vector<8x512xf32> to vector<1x8x512xf32>
    tpu.vector_store %arg2[%c0_34, %c0_35, %c0_36], %81 {strides = array<i32>} : memref<16x8x512xf32, #tpu.memory_space<vmem>>, vector<1x8x512xf32>,
    %c1_37 = arith.constant 1 : index
    %c0_38 = arith.constant 0 : index
    %c0_39 = arith.constant 0 : index
    %82 = vector.load %arg2[%c1_37, %c0_38, %c0_39] : memref<16x8x512xf32, #tpu.memory_space<vmem>>, vector<1x8x512xf32>
    %83 = vector.shape_cast %82 : vector<1x8x512xf32> to vector<8x512xf32>
    %84 = vector.shape_cast %26 : vector<8x512xf32> to vector<1x8x512xf32>
    tpu.vector_store %arg2[%c1_37, %c0_38, %c0_39], %84 {strides = array<i32>} : memref<16x8x512xf32, #tpu.memory_space<vmem>>, vector<1x8x512xf32>,
    %c2_40 = arith.constant 2 : index
    %c0_41 = arith.constant 0 : index
    %c0_42 = arith.constant 0 : index
    %85 = vector.load %arg2[%c2_40, %c0_41, %c0_42] : memref<16x8x512xf32, #tpu.memory_space<vmem>>, vector<1x8x512xf32>
    %86 = vector.shape_cast %85 : vector<1x8x512xf32> to vector<8x512xf32>
    %87 = vector.shape_cast %28 : vector<8x512xf32> to vector<1x8x512xf32>
    tpu.vector_store %arg2[%c2_40, %c0_41, %c0_42], %87 {strides = array<i32>} : memref<16x8x512xf32, #tpu.memory_space<vmem>>, vector<1x8x512xf32>,
    %c3 = arith.constant 3 : index
    %c0_43 = arith.constant 0 : index
    %c0_44 = arith.constant 0 : index
    %88 = vector.load %arg2[%c3, %c0_43, %c0_44] : memref<16x8x512xf32, #tpu.memory_space<vmem>>, vector<1x8x512xf32>
    %89 = vector.shape_cast %88 : vector<1x8x512xf32> to vector<8x512xf32>
    %90 = vector.shape_cast %30 : vector<8x512xf32> to vector<1x8x512xf32>
    tpu.vector_store %arg2[%c3, %c0_43, %c0_44], %90 {strides = array<i32>} : memref<16x8x512xf32, #tpu.memory_space<vmem>>, vector<1x8x512xf32>,
    %c4 = arith.constant 4 : index
    %c0_45 = arith.constant 0 : index
    %c0_46 = arith.constant 0 : index
    %91 = vector.load %arg2[%c4, %c0_45, %c0_46] : memref<16x8x512xf32, #tpu.memory_space<vmem>>, vector<1x8x512xf32>
    %92 = vector.shape_cast %91 : vector<1x8x512xf32> to vector<8x512xf32>
    %93 = vector.shape_cast %33 : vector<8x512xf32> to vector<1x8x512xf32>
    tpu.vector_store %arg2[%c4, %c0_45, %c0_46], %93 {strides = array<i32>} : memref<16x8x512xf32, #tpu.memory_space<vmem>>, vector<1x8x512xf32>,
    %c5 = arith.constant 5 : index
    %c0_47 = arith.constant 0 : index
    %c0_48 = arith.constant 0 : index
    %94 = vector.load %arg2[%c5, %c0_47, %c0_48] : memref<16x8x512xf32, #tpu.memory_space<vmem>>, vector<1x8x512xf32>
    %95 = vector.shape_cast %94 : vector<1x8x512xf32> to vector<8x512xf32>
    %96 = vector.shape_cast %35 : vector<8x512xf32> to vector<1x8x512xf32>
    tpu.vector_store %arg2[%c5, %c0_47, %c0_48], %96 {strides = array<i32>} : memref<16x8x512xf32, #tpu.memory_space<vmem>>, vector<1x8x512xf32>,
    %c6 = arith.constant 6 : index
    %c0_49 = arith.constant 0 : index
    %c0_50 = arith.constant 0 : index
    %97 = vector.load %arg2[%c6, %c0_49, %c0_50] : memref<16x8x512xf32, #tpu.memory_space<vmem>>, vector<1x8x512xf32>
    %98 = vector.shape_cast %97 : vector<1x8x512xf32> to vector<8x512xf32>
    %99 = vector.shape_cast %39 : vector<8x512xf32> to vector<1x8x512xf32>
    tpu.vector_store %arg2[%c6, %c0_49, %c0_50], %99 {strides = array<i32>} : memref<16x8x512xf32, #tpu.memory_space<vmem>>, vector<1x8x512xf32>,
    %c7 = arith.constant 7 : index
    %c0_51 = arith.constant 0 : index
    %c0_52 = arith.constant 0 : index
    %100 = vector.load %arg2[%c7, %c0_51, %c0_52] : memref<16x8x512xf32, #tpu.memory_space<vmem>>, vector<1x8x512xf32>
    %101 = vector.shape_cast %100 : vector<1x8x512xf32> to vector<8x512xf32>
    %102 = vector.shape_cast %41 : vector<8x512xf32> to vector<1x8x512xf32>
    tpu.vector_store %arg2[%c7, %c0_51, %c0_52], %102 {strides = array<i32>} : memref<16x8x512xf32, #tpu.memory_space<vmem>>, vector<1x8x512xf32>,
    %c8 = arith.constant 8 : index
    %c0_53 = arith.constant 0 : index
    %c0_54 = arith.constant 0 : index
    %103 = vector.load %arg2[%c8, %c0_53, %c0_54] : memref<16x8x512xf32, #tpu.memory_space<vmem>>, vector<1x8x512xf32>
    %104 = vector.shape_cast %103 : vector<1x8x512xf32> to vector<8x512xf32>
    %105 = vector.shape_cast %43 : vector<8x512xf32> to vector<1x8x512xf32>
    tpu.vector_store %arg2[%c8, %c0_53, %c0_54], %105 {strides = array<i32>} : memref<16x8x512xf32, #tpu.memory_space<vmem>>, vector<1x8x512xf32>,
    %c9 = arith.constant 9 : index
    %c0_55 = arith.constant 0 : index
    %c0_56 = arith.constant 0 : index
    %106 = vector.load %arg2[%c9, %c0_55, %c0_56] : memref<16x8x512xf32, #tpu.memory_space<vmem>>, vector<1x8x512xf32>
    %107 = vector.shape_cast %106 : vector<1x8x512xf32> to vector<8x512xf32>
    %108 = vector.shape_cast %53 : vector<8x512xf32> to vector<1x8x512xf32>
    tpu.vector_store %arg2[%c9, %c0_55, %c0_56], %108 {strides = array<i32>} : memref<16x8x512xf32, #tpu.memory_space<vmem>>, vector<1x8x512xf32>,
    %c10 = arith.constant 10 : index
    %c0_57 = arith.constant 0 : index
    %c0_58 = arith.constant 0 : index
    %109 = vector.load %arg2[%c10, %c0_57, %c0_58] : memref<16x8x512xf32, #tpu.memory_space<vmem>>, vector<1x8x512xf32>
    %110 = vector.shape_cast %109 : vector<1x8x512xf32> to vector<8x512xf32>
    %111 = vector.shape_cast %56 : vector<8x512xf32> to vector<1x8x512xf32>
    tpu.vector_store %arg2[%c10, %c0_57, %c0_58], %111 {strides = array<i32>} : memref<16x8x512xf32, #tpu.memory_space<vmem>>, vector<1x8x512xf32>,
    %c11 = arith.constant 11 : index
    %c0_59 = arith.constant 0 : index
    %c0_60 = arith.constant 0 : index
    %112 = vector.load %arg2[%c11, %c0_59, %c0_60] : memref<16x8x512xf32, #tpu.memory_space<vmem>>, vector<1x8x512xf32>
    %113 = vector.shape_cast %112 : vector<1x8x512xf32> to vector<8x512xf32>
    %114 = vector.shape_cast %59 : vector<8x512xf32> to vector<1x8x512xf32>
    tpu.vector_store %arg2[%c11, %c0_59, %c0_60], %114 {strides = array<i32>} : memref<16x8x512xf32, #tpu.memory_space<vmem>>, vector<1x8x512xf32>,
    %c12 = arith.constant 12 : index
    %c0_61 = arith.constant 0 : index
    %c0_62 = arith.constant 0 : index
    %115 = vector.load %arg2[%c12, %c0_61, %c0_62] : memref<16x8x512xf32, #tpu.memory_space<vmem>>, vector<1x8x512xf32>
    %116 = vector.shape_cast %115 : vector<1x8x512xf32> to vector<8x512xf32>
    %117 = vector.shape_cast %66 : vector<8x512xf32> to vector<1x8x512xf32>
    tpu.vector_store %arg2[%c12, %c0_61, %c0_62], %117 {strides = array<i32>} : memref<16x8x512xf32, #tpu.memory_space<vmem>>, vector<1x8x512xf32>,
    %c13 = arith.constant 13 : index
    %c0_63 = arith.constant 0 : index
    %c0_64 = arith.constant 0 : index
    %118 = vector.load %arg2[%c13, %c0_63, %c0_64] : memref<16x8x512xf32, #tpu.memory_space<vmem>>, vector<1x8x512xf32>
    %119 = vector.shape_cast %118 : vector<1x8x512xf32> to vector<8x512xf32>
    %120 = vector.shape_cast %69 : vector<8x512xf32> to vector<1x8x512xf32>
    tpu.vector_store %arg2[%c13, %c0_63, %c0_64], %120 {strides = array<i32>} : memref<16x8x512xf32, #tpu.memory_space<vmem>>, vector<1x8x512xf32>,
    %c14 = arith.constant 14 : index
    %c0_65 = arith.constant 0 : index
    %c0_66 = arith.constant 0 : index
    %121 = vector.load %arg2[%c14, %c0_65, %c0_66] : memref<16x8x512xf32, #tpu.memory_space<vmem>>, vector<1x8x512xf32>
    %122 = vector.shape_cast %121 : vector<1x8x512xf32> to vector<8x512xf32>
    %123 = vector.shape_cast %72 : vector<8x512xf32> to vector<1x8x512xf32>
    tpu.vector_store %arg2[%c14, %c0_65, %c0_66], %123 {strides = array<i32>} : memref<16x8x512xf32, #tpu.memory_space<vmem>>, vector<1x8x512xf32>,
    %c15 = arith.constant 15 : index
    %c0_67 = arith.constant 0 : index
    %c0_68 = arith.constant 0 : index
    %124 = vector.load %arg2[%c15, %c0_67, %c0_68] : memref<16x8x512xf32, #tpu.memory_space<vmem>>, vector<1x8x512xf32>
    %125 = vector.shape_cast %124 : vector<1x8x512xf32> to vector<8x512xf32>
    %126 = vector.shape_cast %78 : vector<8x512xf32> to vector<1x8x512xf32>
    tpu.vector_store %arg2[%c15, %c0_67, %c0_68], %126 {strides = array<i32>} : memref<16x8x512xf32, #tpu.memory_space<vmem>>, vector<1x8x512xf32>,
    return
  }
  func.func @transform_0(%arg0: i32) -> (i32, i32, i32) {
    %c0_i32 = arith.constant 0 : i32
    %c0_i32_0 = arith.constant 0 : i32
    %c0_i32_1 = arith.constant 0 : i32
    return %c0_i32, %arg0, %c0_i32_0 : i32, i32, i32
  }
  func.func @transform_1(%arg0: i32) -> (i32, i32, i32) {
    %c0_i32 = arith.constant 0 : i32
    %c0_i32_0 = arith.constant 0 : i32
    %c0_i32_1 = arith.constant 0 : i32
    return %c0_i32, %arg0, %c0_i32_0 : i32, i32, i32
  }
}

</mosaic_0001>

<bundles_post_ra>
// kernel: tpu_custom_call.1
= control target key start
LH: loop header
LB: loop body
LE: loop exit
PB: predicated region body
PF: predicated region fallthrough
CT: control target
= control target key end

     0   :  { %6 = vsyncpa [#allocation3], 0  ;;  %s613_s0 = inlined_call_operand.hbm [shape: f32[3,8,512], index: 0, kind: input, shape index: {}]   ;;  %s614_s1 = inlined_call_operand.hbm [shape: f32[16,8,512], index: 1, kind: output, shape index: {}]  }
   0x1   :  { %7 = vsyncpa [#allocation4], 0  ;;  %s12_s8 = sshll.u32 %s613_s0, 4  ;;  %s386_s9 = smov [#allocation2]   ;;  %s13_s8 = int_to_ptr.hbm [resolvable:$true] %s12_s8 }
   0x2   :  { %s14_s10 = sshll.u32 %s386_s9, 4  ;;  %s387_s11 = smov 512   ;;  %s15_s10 = int_to_ptr.vmem [resolvable:$true] %s14_s10 }
   0x3   :  { %s388_s12 = smov 32  }
   0x4   :  { %20 = dma.hbm_to_vmem [thread:$0]  %s13_s8, 1536, %s15_s10, [#allocation3], %s387_s11, %s387_s11, %s388_s12  }
   0x5   :  { %382 = dma.done.wait [#allocation3], 1536  }
   0x6   :  { %383 = vsyncadd [#allocation3], 4294965760  ;;  %v389_v0 = vmov 0.2820948   ;;  %v38_v1 = vld [vmem:[#allocation2 + $0x20] sm:$0xff]  ;;  %v39_v2 = vld [vmem:[#allocation2 + $0x28] sm:$0xff] }
   0x7   :  { %211 = vst [vmem:[#allocation5] sm:$0xff] %v389_v0  ;;  %v40_v3 = vld [vmem:[#allocation2 + $0x30] sm:$0xff]  ;;  %v42_v4 = vmul.f32 2.0, %v38_v1  ;;  %v43_v5 = vmul.f32 2.0, %v39_v2  ;;  %v41_v7 = vld [vmem:[#allocation2 + $0x38] sm:$0xff]  ;;  %v51_v8 = vld [vmem:[#allocation2 + $0x40] sm:$0xff] }
   0x8   :  { %212 = vst [vmem:[#allocation5 + $0x8] sm:$0xff] %v389_v0  ;;  %v44_v6 = vmul.f32 2.0, %v40_v3  ;;  %v52_v9 = vld [vmem:[#allocation2 + $0x48] sm:$0xff]  ;;  %v45_v10 = vmul.f32 2.0, %v41_v7  ;;  %v55_v11 = vmul.f32 2.0, %v51_v8  ;;  %v53_v13 = vld [vmem:[#allocation2 + $0x50] sm:$0xff] }
   0x9   :  { %213 = vst [vmem:[#allocation5 + $0x10] sm:$0xff] %v389_v0  ;;  %v56_v12 = vmul.f32 2.0, %v52_v9  ;;  %v54_v14 = vld [vmem:[#allocation2 + $0x58] sm:$0xff]  ;;  %v407_v15 = vadd.f32 -1.0, %v42_v4  ;;  %v409_v16 = vadd.f32 -1.0, %v43_v5  ;;  %v57_v18 = vmul.f32 2.0, %v53_v13 }
   0xa   :  { %214 = vst [vmem:[#allocation5 + $0x18] sm:$0xff] %v389_v0  ;;  %v411_v17 = vadd.f32 -1.0, %v44_v6  ;;  %v25_v19 = vld [vmem:[#allocation2] sm:$0xff]  ;;  %v413_v20 = vadd.f32 -1.0, %v45_v10  ;;  %v415_v21 = vadd.f32 -1.0, %v55_v11  ;;  %v58_v22 = vmul.f32 2.0, %v54_v14 }
   0xb   :  { %v26_v23 = vld [vmem:[#allocation2 + $0x8] sm:$0xff]  ;;  %v27_v24 = vld [vmem:[#allocation2 + $0x10] sm:$0xff]  ;;  %v28_v25 = vld [vmem:[#allocation2 + $0x18] sm:$0xff]  ;;  %v87_v26 = vmul.f32 -0.48860252, %v407_v15  ;;  %v421_v30 = vadd.f32 -1.0, %v56_v12 }
   0xc   :  { %v88_v27 = vmul.f32 -0.48860252, %v409_v16  ;;  %v89_v28 = vmul.f32 -0.48860252, %v411_v17  ;;  %v90_v29 = vmul.f32 -0.48860252, %v413_v20  ;;  %v71_v53 = vmul.f32 %v415_v21, %v407_v15 }
   0xd   :  { %216 = vst [vmem:[#allocation5 + $0x20] sm:$0xff] %v87_v26  ;;  %v91_v31 = vmul.f32 0.48860252, %v415_v21  ;;  %v424_v32 = vadd.f32 -1.0, %v57_v18  ;;  %v29_v33 = vmul.f32 2.0, %v25_v19  ;;  %v30_v34 = vmul.f32 2.0, %v26_v23 }
   0xe   :  { %217 = vst [vmem:[#allocation5 + $0x28] sm:$0xff] %v88_v27  ;;  %v92_v35 = vmul.f32 0.48860252, %v421_v30  ;;  %v427_v36 = vadd.f32 -1.0, %v58_v22  ;;  %v31_v37 = vmul.f32 2.0, %v27_v24  ;;  %v32_v38 = vmul.f32 2.0, %v28_v25 }
   0xf   :  { %218 = vst [vmem:[#allocation5 + $0x30] sm:$0xff] %v89_v28  ;;  %v93_v39 = vmul.f32 0.48860252, %v424_v32  ;;  %v430_v40 = vadd.f32 -1.0, %v29_v33  ;;  %v433_v42 = vadd.f32 -1.0, %v30_v34  ;;  %v72_v56 = vmul.f32 %v421_v30, %v409_v16  ;;  %s390_s0 = smov [#allocation5]  }
  0x10   :  { %219 = vst [vmem:[#allocation5 + $0x38] sm:$0xff] %v90_v29  ;;  %v94_v41 = vmul.f32 0.48860252, %v427_v36  ;;  %v436_v44 = vadd.f32 -1.0, %v31_v37  ;;  %v439_v46 = vadd.f32 -1.0, %v32_v38  ;;  %v73_v58 = vmul.f32 %v424_v32, %v411_v17  ;;  %s294_s13 = sshll.u32 %s390_s0, 4  ;;  %s295_s13 = int_to_ptr.vmem [resolvable:$true] %s294_s13 }
  0x11   :  { %221 = vst [vmem:[#allocation5 + $0x40] sm:$0xff] %v91_v31  ;;  %v95_v43 = vmul.f32 -0.48860252, %v430_v40  ;;  %v96_v45 = vmul.f32 -0.48860252, %v433_v42  ;;  %v444_v48 = vmul.f32 %v407_v15, %v430_v40  ;;  %v449_v50 = vmul.f32 %v409_v16, %v433_v42  ;;  %s296_s16 = sshll.u32 %s614_s1, 4  ;;  %s297_s16 = int_to_ptr.hbm [resolvable:$true] %s296_s16 }
  0x12   :  { %222 = vst [vmem:[#allocation5 + $0x48] sm:$0xff] %v92_v35  ;;  %v97_v47 = vmul.f32 -0.48860252, %v436_v44  ;;  %v98_v49 = vmul.f32 -0.48860252, %v439_v46  ;;  %v454_v52 = vmul.f32 %v411_v17, %v436_v44  ;;  %v461_v55 = vmul.f32 %v413_v20, %v439_v46 }
  0x13   :  { %223 = vst [vmem:[#allocation5 + $0x50] sm:$0xff] %v93_v39  ;;  %v103_v51 = vmul.f32 1.0925485, %v444_v48  ;;  %v104_v54 = vmul.f32 1.0925485, %v449_v50  ;;  %v470_v59 = vmul.f32 %v415_v21, %v415_v21  ;;  %v74_v61 = vmul.f32 %v427_v36, %v413_v20 }
  0x14   :  { %224 = vst [vmem:[#allocation5 + $0x58] sm:$0xff] %v94_v41  ;;  %v105_v57 = vmul.f32 1.0925485, %v454_v52  ;;  %v106_v60 = vmul.f32 1.0925485, %v461_v55  ;;  %v477_v62 = vmul.f32 %v421_v30, %v421_v30  ;;  %v482_v1 = vmul.f32 %v424_v32, %v424_v32 }
  0x15   :  { %226 = vst [vmem:[#allocation5 + $0x60] sm:$0xff] %v95_v43  ;;  %v107_v63 = vmul.f32 -1.0925485, %v71_v53  ;;  %v111_v0 = vmul.f32 0.9461747, %v470_v59  ;;  %v487_v4 = vmul.f32 %v427_v36, %v427_v36  ;;  %v67_v10 = vmul.f32 %v415_v21, %v430_v40 }
  0x16   :  { %227 = vst [vmem:[#allocation5 + $0x68] sm:$0xff] %v96_v45  ;;  %v108_v2 = vmul.f32 -1.0925485, %v72_v56  ;;  %v112_v3 = vmul.f32 0.9461747, %v477_v62  ;;  %v495_v11 = vmul.f32 %v430_v40, %v430_v40  ;;  %v68_v13 = vmul.f32 %v421_v30, %v433_v42 }
  0x17   :  { %228 = vst [vmem:[#allocation5 + $0x70] sm:$0xff] %v97_v47  ;;  %v109_v5 = vmul.f32 -1.0925485, %v73_v58  ;;  %v113_v6 = vmul.f32 0.9461747, %v482_v1  ;;  %v501_v14 = vmul.f32 %v433_v42, %v433_v42  ;;  %v69_v19 = vmul.f32 %v424_v32, %v436_v44 }
  0x18   :  { %229 = vst [vmem:[#allocation5 + $0x78] sm:$0xff] %v98_v49  ;;  %v110_v7 = vmul.f32 -1.0925485, %v74_v61  ;;  %v114_v8 = vmul.f32 0.9461747, %v487_v4  ;;  %v507_v22 = vmul.f32 %v407_v15, %v407_v15  ;;  %v511_v23 = vmul.f32 %v436_v44, %v436_v44 }
  0x19   :  { %231 = vst [vmem:[#allocation5 + $0x80] sm:$0xff] %v103_v51  ;;  %v321_v9 = vadd.f32 -0.31539157, %v111_v0  ;;  %v322_v12 = vadd.f32 -0.31539157, %v112_v3  ;;  %v70_v25 = vmul.f32 %v427_v36, %v439_v46  ;;  %v517_v26 = vmul.f32 %v409_v16, %v409_v16 }
  0x1a   :  { %232 = vst [vmem:[#allocation5 + $0x88] sm:$0xff] %v104_v54  ;;  %v323_v18 = vadd.f32 -0.31539157, %v113_v6  ;;  %v324_v24 = vadd.f32 -0.31539157, %v114_v8  ;;  %v521_v27 = vmul.f32 %v439_v46, %v439_v46  ;;  %v525_v29 = vsub.f32 %v495_v11, %v507_v22 }
  0x1b   :  { %233 = vst [vmem:[#allocation5 + $0x90] sm:$0xff] %v105_v57  ;;  %v119_v28 = vmul.f32 -1.0925485, %v67_v10  ;;  %v529_v31 = vmul.f32 %v411_v17, %v411_v17  ;;  %v139_v33 = vmul.f32 3.0, %v495_v11  ;;  %v120_v34 = vmul.f32 -1.0925485, %v68_v13 }
  0x1c   :  { %234 = vst [vmem:[#allocation5 + $0x98] sm:$0xff] %v106_v60  ;;  %v534_v35 = vsub.f32 %v501_v14, %v517_v26  ;;  %v538_v37 = vmul.f32 %v413_v20, %v413_v20  ;;  %v140_v38 = vmul.f32 3.0, %v501_v14  ;;  %v121_v39 = vmul.f32 -1.0925485, %v69_v19 }
  0x1d   :  { %236 = vst [vmem:[#allocation5 + $0xa0] sm:$0xff] %v107_v63  ;;  %v543_v41 = vsub.f32 %v511_v23, %v529_v31  ;;  %v141_v43 = vmul.f32 3.0, %v511_v23  ;;  %v122_v45 = vmul.f32 -1.0925485, %v70_v25  ;;  %v142_v49 = vmul.f32 3.0, %v521_v27 }
  0x1e   :  { %237 = vst [vmem:[#allocation5 + $0xa8] sm:$0xff] %v108_v2  ;;  %v548_v47 = vsub.f32 %v521_v27, %v538_v37  ;;  %v123_v51 = vmul.f32 0.54627424, %v525_v29  ;;  %v135_v53 = vmul.f32 0.5900436, %v407_v15  ;;  %v143_v54 = vsub.f32 %v507_v22, %v139_v33 }
  0x1f   :  { %238 = vst [vmem:[#allocation5 + $0xb0] sm:$0xff] %v109_v5  ;;  %v124_v56 = vmul.f32 0.54627424, %v534_v35  ;;  %v136_v57 = vmul.f32 0.5900436, %v409_v16  ;;  %v144_v58 = vsub.f32 %v517_v26, %v140_v38  ;;  %v145_v63 = vsub.f32 %v529_v31, %v141_v43 }
  0x20   :  { %239 = vst [vmem:[#allocation5 + $0xb8] sm:$0xff] %v110_v7  ;;  %v125_v60 = vmul.f32 0.54627424, %v543_v41  ;;  %v137_v61 = vmul.f32 0.5900436, %v411_v17  ;;  %v146_v3 = vsub.f32 %v538_v37, %v142_v49  ;;  %v147_v5 = vmul.f32 %v143_v54, %v135_v53 }
  0x21   :  { %241 = vst [vmem:[#allocation5 + $0xc0] sm:$0xff] %v321_v9  ;;  %v126_v0 = vmul.f32 0.54627424, %v548_v47  ;;  %v138_v2 = vmul.f32 0.5900436, %v413_v20  ;;  %v127_v7 = vmul.f32 5.0, %v470_v59  ;;  %v148_v8 = vmul.f32 %v144_v58, %v136_v57 }
  0x22   :  { %242 = vst [vmem:[#allocation5 + $0xc8] sm:$0xff] %v322_v12  ;;  %v151_v6 = vmul.f32 2.8906114, %v444_v48  ;;  %v152_v9 = vmul.f32 2.8906114, %v449_v50  ;;  %v128_v10 = vmul.f32 5.0, %v477_v62  ;;  %v149_v12 = vmul.f32 %v145_v63, %v137_v61 }
  0x23   :  { %243 = vst [vmem:[#allocation5 + $0xd0] sm:$0xff] %v323_v18  ;;  %v153_v13 = vmul.f32 2.8906114, %v454_v52  ;;  %v129_v18 = vmul.f32 5.0, %v482_v1  ;;  %v150_v19 = vmul.f32 %v146_v3, %v138_v2  ;;  %v130_v48 = vmul.f32 5.0, %v487_v4 }
  0x24   :  { %244 = vst [vmem:[#allocation5 + $0xd8] sm:$0xff] %v324_v24  ;;  %v154_v24 = vmul.f32 2.8906114, %v461_v55  ;;  %v155_v59 = vmul.f32 %v415_v21, %v151_v6  ;;  %v131_v25 = vsub.f32 1.0, %v127_v7  ;;  %v159_v50 = vmul.f32 0.4570458, %v407_v15 }
  0x25   :  { %246 = vst [vmem:[#allocation5 + $0xe0] sm:$0xff] %v119_v28  ;;  %v156_v62 = vmul.f32 %v421_v30, %v152_v9  ;;  %v132_v28 = vsub.f32 1.0, %v128_v10  ;;  %v160_v52 = vmul.f32 0.4570458, %v409_v16  ;;  %v157_v1 = vmul.f32 %v424_v32, %v153_v13 }
  0x26   :  { %247 = vst [vmem:[#allocation5 + $0xe8] sm:$0xff] %v120_v34  ;;  %v133_v33 = vsub.f32 1.0, %v129_v18  ;;  %v161_v55 = vmul.f32 0.4570458, %v411_v17  ;;  %v158_v4 = vmul.f32 %v427_v36, %v154_v24  ;;  %v134_v34 = vsub.f32 1.0, %v130_v48 }
  0x27   :  { %248 = vst [vmem:[#allocation5 + $0xf0] sm:$0xff] %v121_v39  ;;  %v162_v38 = vmul.f32 0.4570458, %v413_v20  ;;  %v163_v15 = vmul.f32 %v159_v50, %v131_v25  ;;  %v167_v39 = vmul.f32 0.37317634, %v415_v21  ;;  %v325_v43 = vadd.f32 -3.0, %v127_v7 }
  0x28   :  { %249 = vst [vmem:[#allocation5 + $0xf8] sm:$0xff] %v122_v45  ;;  %v164_v45 = vmul.f32 %v160_v52, %v132_v28  ;;  %v168_v16 = vmul.f32 0.37317634, %v421_v30  ;;  %v326_v49 = vadd.f32 -3.0, %v128_v10  ;;  %v169_v17 = vmul.f32 0.37317634, %v424_v32 }
  0x29   :  { %251 = vst [vmem:[#allocation5 + $0x100] sm:$0xff] %v123_v51  ;;  %v165_v51 = vmul.f32 %v161_v55, %v133_v33  ;;  %v327_v53 = vadd.f32 -3.0, %v129_v18  ;;  %v166_v54 = vmul.f32 %v162_v38, %v134_v34  ;;  %v328_v20 = vadd.f32 -3.0, %v130_v48 }
  0x2a   :  { %252 = vst [vmem:[#allocation5 + $0x108] sm:$0xff] %v124_v56  ;;  %v170_v56 = vmul.f32 0.37317634, %v427_v36  ;;  %v175_v57 = vmul.f32 %v325_v43, %v167_v39  ;;  %v179_v58 = vmul.f32 0.4570458, %v430_v40  ;;  %v199_v7 = vmul.f32 3.0, %v507_v22 }
  0x2b   :  { %253 = vst [vmem:[#allocation5 + $0x110] sm:$0xff] %v125_v60  ;;  %v176_v60 = vmul.f32 %v326_v49, %v168_v16  ;;  %v180_v61 = vmul.f32 0.4570458, %v433_v42  ;;  %v177_v63 = vmul.f32 %v327_v53, %v169_v17  ;;  %v182_v3 = vmul.f32 0.4570458, %v439_v46 }
  0x2c   :  { %254 = vst [vmem:[#allocation5 + $0x118] sm:$0xff] %v126_v0  ;;  %v181_v0 = vmul.f32 0.4570458, %v436_v44  ;;  %v178_v2 = vmul.f32 %v328_v20, %v170_v56  ;;  %v187_v6 = vmul.f32 1.4453057, %v415_v21  ;;  %v200_v10 = vmul.f32 3.0, %v517_v26 }
  0x2d   :  { %256 = vst [vmem:[#allocation5 + $0x120] sm:$0xff] %v147_v5  ;;  %v183_v5 = vmul.f32 %v179_v58, %v131_v25  ;;  %v188_v9 = vmul.f32 1.4453057, %v421_v30  ;;  %v189_v13 = vmul.f32 1.4453057, %v424_v32  ;;  %v201_v18 = vmul.f32 3.0, %v529_v31 }
  0x2e   :  { %257 = vst [vmem:[#allocation5 + $0x128] sm:$0xff] %v148_v8  ;;  %v184_v8 = vmul.f32 %v180_v61, %v132_v28  ;;  %v190_v24 = vmul.f32 1.4453057, %v427_v36  ;;  %v202_v21 = vmul.f32 3.0, %v538_v37  ;;  %v191_v22 = vmul.f32 %v187_v6, %v525_v29 }
  0x2f   :  { %258 = vst [vmem:[#allocation5 + $0x130] sm:$0xff] %v149_v12  ;;  %v185_v12 = vmul.f32 %v181_v0, %v133_v33  ;;  %v195_v48 = vmul.f32 0.5900436, %v430_v40  ;;  %v203_v30 = vsub.f32 %v199_v7, %v495_v11  ;;  %v192_v26 = vmul.f32 %v188_v9, %v534_v35 }
  0x30   :  { %259 = vst [vmem:[#allocation5 + $0x138] sm:$0xff] %v150_v19  ;;  %v186_v19 = vmul.f32 %v182_v3, %v134_v34  ;;  %v196_v32 = vmul.f32 0.5900436, %v433_v42  ;;  %v204_v31 = vsub.f32 %v200_v10, %v501_v14  ;;  %v197_v36 = vmul.f32 0.5900436, %v436_v44 }
  0x31   :  { %261 = vst [vmem:[#allocation5 + $0x140] sm:$0xff] %v155_v59  ;;  %v193_v59 = vmul.f32 %v189_v13, %v543_v41  ;;  %v205_v37 = vsub.f32 %v201_v18, %v511_v23  ;;  %v194_v29 = vmul.f32 %v190_v24, %v548_v47  ;;  %v198_v40 = vmul.f32 0.5900436, %v439_v46 }
  0x32   :  { %262 = vst [vmem:[#allocation5 + $0x148] sm:$0xff] %v156_v62  ;;  %v206_v11 = vsub.f32 %v202_v21, %v521_v27  ;;  %v207_v35 = vmul.f32 %v203_v30, %v195_v48  ;;  %v208_v42 = vmul.f32 %v204_v31, %v196_v32 }
  0x33   :  { %263 = vst [vmem:[#allocation5 + $0x150] sm:$0xff] %v157_v1  ;;  %v209_v14 = vmul.f32 %v205_v37, %v197_v36 }
  0x34   :  { %264 = vst [vmem:[#allocation5 + $0x158] sm:$0xff] %v158_v4  ;;  %v210_v44 = vmul.f32 %v206_v11, %v198_v40 }
  0x35   :  { %266 = vst [vmem:[#allocation5 + $0x160] sm:$0xff] %v163_v15 }
  0x36   :  { %267 = vst [vmem:[#allocation5 + $0x168] sm:$0xff] %v164_v45 }
  0x37   :  { %268 = vst [vmem:[#allocation5 + $0x170] sm:$0xff] %v165_v51 }
  0x38   :  { %269 = vst [vmem:[#allocation5 + $0x178] sm:$0xff] %v166_v54 }
  0x39   :  { %271 = vst [vmem:[#allocation5 + $0x180] sm:$0xff] %v175_v57 }
  0x3a   :  { %272 = vst [vmem:[#allocation5 + $0x188] sm:$0xff] %v176_v60 }
  0x3b   :  { %273 = vst [vmem:[#allocation5 + $0x190] sm:$0xff] %v177_v63 }
  0x3c   :  { %274 = vst [vmem:[#allocation5 + $0x198] sm:$0xff] %v178_v2 }
  0x3d   :  { %276 = vst [vmem:[#allocation5 + $0x1a0] sm:$0xff] %v183_v5 }
  0x3e   :  { %277 = vst [vmem:[#allocation5 + $0x1a8] sm:$0xff] %v184_v8 }
  0x3f   :  { %278 = vst [vmem:[#allocation5 + $0x1b0] sm:$0xff] %v185_v12 }
  0x40   :  { %279 = vst [vmem:[#allocation5 + $0x1b8] sm:$0xff] %v186_v19 }
  0x41   :  { %281 = vst [vmem:[#allocation5 + $0x1c0] sm:$0xff] %v191_v22 }
  0x42   :  { %282 = vst [vmem:[#allocation5 + $0x1c8] sm:$0xff] %v192_v26 }
  0x43   :  { %283 = vst [vmem:[#allocation5 + $0x1d0] sm:$0xff] %v193_v59 }
  0x44   :  { %284 = vst [vmem:[#allocation5 + $0x1d8] sm:$0xff] %v194_v29 }
  0x45   :  { %286 = vst [vmem:[#allocation5 + $0x1e0] sm:$0xff] %v207_v35 }
  0x46   :  { %287 = vst [vmem:[#allocation5 + $0x1e8] sm:$0xff] %v208_v42 }
  0x47   :  { %288 = vst [vmem:[#allocation5 + $0x1f0] sm:$0xff] %v209_v14 }
  0x48   :  { %289 = vst [vmem:[#allocation5 + $0x1f8] sm:$0xff] %v210_v44 }
  0x49   :  { %302 = dma.vmem_to_hbm [thread:$0]  %s295_s13, 8192, %s297_s16, [#allocation4], %s387_s11, %s387_s11, %s388_s12  }
  0x4a   :  { %384 = dma.done.wait [#allocation4], 8192  }
  0x4b   :  { %385 = vsyncadd [#allocation4], 4294959104 }
  0x4c   :  { %307 = vsyncpa [#allocation3], 1 }
  0x4d   :  { %308 = vsyncpa [#allocation4], 1 }

</bundles_post_ra>
